<compile_context>
chip_gen: v7x
topology: tpu7x:2x2x1
jax: 0.10.0
libtpu: 0.0.40
codegen_flags: <defaults>
</compile_context>

<pallas_src>
import jax
import jax.numpy as jnp
from jax.experimental import pallas as pl
from jax.experimental.pallas import tpu as pltpu


def _round_up(x, m):
    return ((x + m - 1) // m) * m


def _vmem_budget_bytes():
    """Conservative per-generation VMEM budget used for tile sizing."""
    try:
        kind = jax.devices()[0].device_kind.lower().replace(" ", "")
    except Exception:
        kind = ""
    if "v7" in kind or "tpu7" in kind:
        return 48 * 1024 * 1024          # v7x: 64 MiB physical per TensorCore
    if "v6" in kind or "v5" in kind or "v4" in kind:
        return 96 * 1024 * 1024          # 128 MiB physical
    return 32 * 1024 * 1024              # unknown: keep the default scoped limit


def _auto_block_b(Sp, Hp, key_itemsize, budget_bytes):
    """Pick the batch tile TB so one pipelined grid step fits the VMEM budget."""
    # Grid-invariant (resident) blocks: Wa^T and Ua^T (double-buffered by the
    # pipeline) plus the small bias / Va rows.
    resident = 2 * 2 * Hp * Hp * key_itemsize + 4 * Hp * 4
    avail = max(budget_bytes - resident, budget_bytes // 8)
    # Per batch element per step: double-buffered keys block, f32 intermediates
    # (ua_k, tanh, context product), double-buffered f32 outputs, query block.
    per_b = (2 * Sp * Hp * key_itemsize
             + 3 * Sp * Hp * 4
             + 2 * (Hp + Sp) * 4
             + 2 * Hp * key_itemsize)
    tb = int(avail // per_b)
    tb = max(8, min(tb, 256))
    return (tb // 8) * 8


def _make_kernel(s_valid, approx_recip):
    def kernel(q_ref, k_ref, wa_t_ref, ua_t_ref, qbias_ref, va_ref,
               ctx_ref, w_ref):
        tb, s_pad, h_pad = k_ref.shape

        q = q_ref[...]                                               # (TB, Hp)
        k = k_ref[...]                                               # (TB, Sp, Hp)

        # Wa(q) with both Linear biases folded in (ba + bu); f32 accumulation.
        qb = jnp.dot(q, wa_t_ref[...],
                     preferred_element_type=jnp.float32) + qbias_ref[...]

        # Ua(keys): single flattened (TB*Sp, Hp) @ (Hp, Hp) MXU pass.
        ua_k = jnp.dot(k.reshape(tb * s_pad, h_pad), ua_t_ref[...],
                       preferred_element_type=jnp.float32)
        ua_k = ua_k.reshape(tb, s_pad, h_pad)

        t = jnp.tanh(ua_k + qb[:, None, :])                          # (TB, Sp, Hp) f32

        # Va(.): lane reduction over Hp -> lane-dense scores (TB, Sp).
        # (Va bias dropped: a constant added before softmax is a no-op.)
        scores = jnp.sum(t * va_ref[...], axis=-1)                   # (TB, Sp)

        if s_valid < s_pad:  # static: mask zero-padded key positions out of softmax
            lane = jax.lax.broadcasted_iota(jnp.int32, scores.shape, 1)
            scores = jnp.where(lane < s_valid, scores, -jnp.inf)

        # Softmax over S (lane axis), f32 stats.
        m = jnp.max(scores, axis=-1, keepdims=True)
        e = jnp.exp(scores - m)
        denom = jnp.sum(e, axis=-1, keepdims=True)
        w = e * pl.reciprocal(denom, approx=approx_recip)            # (TB, Sp)

        # context = weights @ keys with q == 1: VPU weighted sum over S
        # (skips the M=1 MXU matmul; keeps the accumulation in f32).
        ctx = jnp.sum(w[:, :, None] * k.astype(jnp.float32), axis=1)  # (TB, Hp)

        ctx_ref[...] = ctx.astype(ctx_ref.dtype)                     # lane-dense store
        w_ref[...] = w.astype(w_ref.dtype)                           # lane-dense store
    return kernel


def bahdanau_attention(query, keys, params, *, block_b=None,
                       compute_dtype=jnp.float32, approx_recip=False,
                       vmem_budget_bytes=None):
    """query: (B, 1, H); keys: (B, S, H) -> (context (B,1,H), weights (B,1,S))."""
    B, one, H = query.shape
    assert one == 1
    Bk, S, Hk = keys.shape
    assert Bk == B and Hk == H

    wa_w, wa_b, ua_w, ua_b, va_w, va_b = params
    del va_b  # a scalar added before softmax changes neither weights nor context

    # Lane-dense padding of the feature / sequence axes (no-op at prod sizes).
    Hp = _round_up(H, 128)
    Sp = _round_up(S, 128)

    if vmem_budget_bytes is None:
        vmem_budget_bytes = _vmem_budget_bytes()
    key_itemsize = jnp.dtype(compute_dtype).itemsize

    # TODO(synk): for S in the thousands add an "arbitrary" S grid axis with an
    # online-softmax (running max/sum + f32 context scratch, flash pattern) so
    # the keys block stays within VMEM on every generation.
    if block_b is None:
        block_b = _auto_block_b(Sp, Hp, key_itemsize, vmem_budget_bytes)

    tb = min(block_b, B)
    if tb < B and tb % 8:
        tb = min(B, _round_up(tb, 8))            # sublane-aligned batch tiles
    if tb == B and B >= 16:
        tb = _round_up(pl.cdiv(B, 2), 8)         # >=2 grid steps for v7x's 2 TCs
    n_steps = pl.cdiv(B, tb)
    b_pad = n_steps * tb

    # One-time layout / dtype prep (outside the per-step path):
    #   pre-transpose Wa/Ua so the kernel does x @ W^T, fold the Ua bias into
    #   the query-side bias, zero-pad to lane-full shapes, and cast the matmul
    #   operands to compute_dtype (f32 accumulation stays in the kernel).
    wa_t = jnp.pad(wa_w.T, ((0, Hp - H), (0, Hp - H))).astype(compute_dtype)
    ua_t = jnp.pad(ua_w.T, ((0, Hp - H), (0, Hp - H))).astype(compute_dtype)
    qbias = jnp.pad((wa_b + ua_b).reshape(1, H).astype(jnp.float32),
                    ((0, 0), (0, Hp - H)))
    va2 = jnp.pad(va_w.reshape(1, H).astype(jnp.float32), ((0, 0), (0, Hp - H)))

    q2 = jnp.pad(query.reshape(B, H),
                 ((0, b_pad - B), (0, Hp - H))).astype(compute_dtype)
    keys_p = jnp.pad(keys,
                     ((0, b_pad - B), (0, Sp - S), (0, Hp - H))).astype(compute_dtype)

    rep = lambda b: (0, 0)                       # grid-invariant weight/bias blocks

    grid_spec = pltpu.PrefetchScalarGridSpec(
        num_scalar_prefetch=0,
        grid=(n_steps,),
        in_specs=[
            pl.BlockSpec((tb, Hp), lambda b: (b, 0)),         # query (squeezed)
            pl.BlockSpec((tb, Sp, Hp), lambda b: (b, 0, 0)),  # keys
            pl.BlockSpec((Hp, Hp), rep),                      # Wa^T (resident)
            pl.BlockSpec((Hp, Hp), rep),                      # Ua^T (resident)
            pl.BlockSpec((1, Hp), rep),                       # folded bias (ba+bu)
            pl.BlockSpec((1, Hp), rep),                       # Va weight row
        ],
        out_specs=[
            pl.BlockSpec((tb, Hp), lambda b: (b, 0)),         # context (lane-dense)
            pl.BlockSpec((tb, Sp), lambda b: (b, 0)),         # weights (lane-dense)
        ],
    )

    ctx2, w2 = pl.pallas_call(
        _make_kernel(S, approx_recip),
        out_shape=(
            jax.ShapeDtypeStruct((b_pad, Hp), jnp.float32),
            jax.ShapeDtypeStruct((b_pad, Sp), jnp.float32),
        ),
        grid_spec=grid_spec,
        compiler_params=pltpu.CompilerParams(
            dimension_semantics=("parallel",),
            vmem_limit_bytes=int(vmem_budget_bytes),
        ),
    )(q2, keys_p, wa_t, ua_t, qbias, va2)

    context = ctx2[:B, :H].reshape(B, 1, H)
    weights = w2[:B, :S].reshape(B, 1, S)
    return context, weights


def init_params(key, hidden_size):
    """Deterministic params; PyTorch nn.Linear layout: weight (out, in), bias (out,)."""
    ks = jax.random.split(key, 6)
    bound = 1.0 / jnp.sqrt(hidden_size)
    wa_w = jax.random.uniform(ks[0], (hidden_size, hidden_size), jnp.float32, -bound, bound)
    wa_b = jax.random.uniform(ks[1], (hidden_size,), jnp.float32, -bound, bound)
    ua_w = jax.random.uniform(ks[2], (hidden_size, hidden_size), jnp.float32, -bound, bound)
    ua_b = jax.random.uniform(ks[3], (hidden_size,), jnp.float32, -bound, bound)
    va_w = jax.random.uniform(ks[4], (1, hidden_size), jnp.float32, -bound, bound)
    va_b = jax.random.uniform(ks[5], (1,), jnp.float32, -bound, bound)
    return (wa_w, wa_b, ua_w, ua_b, va_w, va_b)


def reference(query, keys, params):
    wa_w, wa_b, ua_w, ua_b, va_w, va_b = params
    wa_q = query @ wa_w.T + wa_b                        # (B, 1, H)
    ua_k = keys @ ua_w.T + ua_b                         # (B, S, H)
    scores = jnp.tanh(wa_q + ua_k) @ va_w.T + va_b      # (B, S, 1)
    scores = jnp.transpose(scores, (0, 2, 1))           # (B, 1, S)
    weights = jax.nn.softmax(scores, axis=-1)
    context = jnp.einsum("bls,bsh->blh", weights, keys)
    return context, weights


if __name__ == "__main__":
    B, S, H = 2, 8, 32
    key = jax.random.PRNGKey(0)
    kq, kk, kp = jax.random.split(key, 3)
    query = jax.random.normal(kq, (B, 1, H), jnp.float32)
    keys = jax.random.normal(kk, (B, S, H), jnp.float32)
    params = init_params(kp, H)

    ctx_ref, w_ref = reference(query, keys, params)

    # Exact f32 path (tight check against the pure-JAX reference).
    ctx, w = bahdanau_attention(query, keys, params)
    jax.block_until_ready((ctx, w))
    assert jnp.allclose(ctx, ctx_ref, atol=1e-4, rtol=1e-4), "context mismatch (f32)"
    assert jnp.allclose(w, w_ref, atol=1e-4, rtol=1e-4), "weights mismatch (f32)"

    # Production-style path: bf16 matmul operands (f32 accumulation / softmax)
    # plus the EUP approximate reciprocal; looser tolerance reflects bf16 input
    # rounding only.
    ctx_bf, w_bf = bahdanau_attention(query, keys, params,
                                      compute_dtype=jnp.bfloat16,
                                      approx_recip=True)
    jax.block_until_ready((ctx_bf, w_bf))
    assert jnp.allclose(ctx_bf, ctx_ref, atol=5e-2, rtol=5e-2), "context mismatch (bf16)"
    assert jnp.allclose(w_bf, w_ref, atol=5e-2, rtol=5e-2), "weights mismatch (bf16)"

    print("KERNEL_OK")
</pallas_src>

<mosaic_0001>
module attributes {stable_mosaic.version = 11 : i64} {
  func.func @kernel(%arg0: i32, %arg1: memref<2x128xf32, #tpu.memory_space<vmem>>, %arg2: memref<2x128x128xf32, #tpu.memory_space<vmem>>, %arg3: memref<128x128xf32, #tpu.memory_space<vmem>>, %arg4: memref<128x128xf32, #tpu.memory_space<vmem>>, %arg5: memref<1x128xf32, #tpu.memory_space<vmem>>, %arg6: memref<1x128xf32, #tpu.memory_space<vmem>>, %arg7: memref<2x128xf32, #tpu.memory_space<vmem>>, %arg8: memref<2x128xf32, #tpu.memory_space<vmem>>) attributes {dimension_semantics = [#tpu.dimension_semantics<parallel>], iteration_bounds = array<i64: 1>, scalar_prefetch = 0 : i64, scratch_operands = 0 : i64, tpu.core_type = #tpu.core_type<tc>, window_params = [{transform_indices = @transform_0, window_bounds = array<i64: 2, 128>}, {transform_indices = @transform_1, window_bounds = array<i64: 2, 128, 128>}, {pipeline_mode = #tpu.pipeline_mode<synchronous>, transform_indices = @transform_2, window_bounds = array<i64: 128, 128>}, {pipeline_mode = #tpu.pipeline_mode<synchronous>, transform_indices = @transform_3, window_bounds = array<i64: 128, 128>}, {pipeline_mode = #tpu.pipeline_mode<synchronous>, transform_indices = @transform_4, window_bounds = array<i64: 1, 128>}, {pipeline_mode = #tpu.pipeline_mode<synchronous>, transform_indices = @transform_5, window_bounds = array<i64: 1, 128>}, {transform_indices = @transform_6, window_bounds = array<i64: 2, 128>}, {transform_indices = @transform_7, window_bounds = array<i64: 2, 128>}]} {
    %c0 = arith.constant 0 : index
    %c0_0 = arith.constant 0 : index
    %0 = vector.load %arg1[%c0, %c0_0] : memref<2x128xf32, #tpu.memory_space<vmem>>, vector<2x128xf32>
    %c0_1 = arith.constant 0 : index
    %c0_2 = arith.constant 0 : index
    %c0_3 = arith.constant 0 : index
    %1 = vector.load %arg2[%c0_1, %c0_2, %c0_3] : memref<2x128x128xf32, #tpu.memory_space<vmem>>, vector<2x128x128xf32>
    %c0_4 = arith.constant 0 : index
    %c0_5 = arith.constant 0 : index
    %2 = vector.load %arg3[%c0_4, %c0_5] : memref<128x128xf32, #tpu.memory_space<vmem>>, vector<128x128xf32>
    %cst = arith.constant dense<0.000000e+00> : vector<2x128xf32>
    %3 = tpu.matmul %0, %2, %cst {dimension_numbers = #tpu.dot_dimension_numbers<[1], [0], [0], [1], [0, 0, 1, 1], [], []>} : vector<2x128xf32>, vector<128x128xf32>, vector<2x128xf32> -> vector<2x128xf32>
    %c0_6 = arith.constant 0 : index
    %c0_7 = arith.constant 0 : index
    %4 = vector.load %arg5[%c0_6, %c0_7] : memref<1x128xf32, #tpu.memory_space<vmem>>, vector<1x128xf32>
    %5 = vector.broadcast %4 : vector<1x128xf32> to vector<2x128xf32>
    %6 = arith.addf %3, %5 : vector<2x128xf32>
    %7 = vector.shape_cast %1 : vector<2x128x128xf32> to vector<256x128xf32>
    %c0_8 = arith.constant 0 : index
    %c0_9 = arith.constant 0 : index
    %8 = vector.load %arg4[%c0_8, %c0_9] : memref<128x128xf32, #tpu.memory_space<vmem>>, vector<128x128xf32>
    %cst_10 = arith.constant dense<0.000000e+00> : vector<256x128xf32>
    %9 = tpu.matmul %7, %8, %cst_10 {dimension_numbers = #tpu.dot_dimension_numbers<[1], [0], [0], [1], [0, 0, 1, 1], [], []>} : vector<256x128xf32>, vector<128x128xf32>, vector<256x128xf32> -> vector<256x128xf32>
    %10 = vector.shape_cast %9 : vector<256x128xf32> to vector<2x128x128xf32>
    %11 = vector.shape_cast %6 : vector<2x128xf32> to vector<2x1x128xf32>
    %12 = vector.broadcast %11 : vector<2x1x128xf32> to vector<2x128x128xf32>
    %13 = arith.addf %10, %12 : vector<2x128x128xf32>
    %14 = math.tanh %13 : vector<2x128x128xf32>
    %c0_11 = arith.constant 0 : index
    %c0_12 = arith.constant 0 : index
    %15 = vector.load %arg6[%c0_11, %c0_12] : memref<1x128xf32, #tpu.memory_space<vmem>>, vector<1x128xf32>
    %16 = vector.shape_cast %15 : vector<1x128xf32> to vector<1x1x128xf32>
    %17 = vector.broadcast %16 : vector<1x1x128xf32> to vector<2x128x128xf32>
    %18 = arith.mulf %14, %17 : vector<2x128x128xf32>
    %cst_13 = arith.constant dense<0.000000e+00> : vector<2x128xf32>
    %19 = vector.multi_reduction <add>, %18, %cst_13 [2] : vector<2x128x128xf32> to vector<2x128xf32>
    %20 = tpu.iota {dimensions = array<i32: 1>} : vector<2x128xi32>
    %c8_i32 = arith.constant 8 : i32
    %21 = vector.broadcast %c8_i32 : i32 to vector<2x128xi32>
    %22 = arith.cmpi slt, %20, %21 : vector<2x128xi32>
    %cst_14 = arith.constant 0xFF800000 : f32
    %23 = vector.broadcast %cst_14 : f32 to vector<2x128xf32>
    %24 = arith.select %22, %19, %23 : vector<2x128xi1>, vector<2x128xf32>
    %cst_15 = arith.constant dense<0xFF800000> : vector<2xf32>
    %25 = vector.multi_reduction <maximumf>, %24, %cst_15 [1] : vector<2x128xf32> to vector<2xf32>
    %26 = vector.shape_cast %25 : vector<2xf32> to vector<2x1xf32>
    %27 = vector.broadcast %26 : vector<2x1xf32> to vector<2x128xf32>
    %28 = arith.subf %24, %27 : vector<2x128xf32>
    %29 = math.exp %28 : vector<2x128xf32>
    %cst_16 = arith.constant dense<0.000000e+00> : vector<2xf32>
    %30 = vector.multi_reduction <add>, %29, %cst_16 [1] : vector<2x128xf32> to vector<2xf32>
    %31 = vector.shape_cast %30 : vector<2xf32> to vector<2x1xf32>
    %32 = tpu.reciprocal %31 : vector<2x1xf32> -> vector<2x1xf32>
    %33 = vector.broadcast %32 : vector<2x1xf32> to vector<2x128xf32>
    %34 = arith.mulf %29, %33 : vector<2x128xf32>
    %35 = vector.shape_cast %34 : vector<2x128xf32> to vector<2x128x1xf32>
    %36 = vector.broadcast %35 : vector<2x128x1xf32> to vector<2x128x128xf32>
    %37 = arith.mulf %36, %1 : vector<2x128x128xf32>
    %cst_17 = arith.constant dense<0.000000e+00> : vector<2x128xf32>
    %38 = vector.multi_reduction <add>, %37, %cst_17 [1] : vector<2x128x128xf32> to vector<2x128xf32>
    %c0_18 = arith.constant 0 : index
    %c0_19 = arith.constant 0 : index
    %39 = vector.load %arg7[%c0_18, %c0_19] : memref<2x128xf32, #tpu.memory_space<vmem>>, vector<2x128xf32>
    tpu.vector_store %arg7[%c0_18, %c0_19], %38 {strides = array<i32>} : memref<2x128xf32, #tpu.memory_space<vmem>>, vector<2x128xf32>,
    %c0_20 = arith.constant 0 : index
    %c0_21 = arith.constant 0 : index
    %40 = vector.load %arg8[%c0_20, %c0_21] : memref<2x128xf32, #tpu.memory_space<vmem>>, vector<2x128xf32>
    tpu.vector_store %arg8[%c0_20, %c0_21], %34 {strides = array<i32>} : memref<2x128xf32, #tpu.memory_space<vmem>>, vector<2x128xf32>,
    return
  }
  func.func @transform_0(%arg0: i32) -> (i32, i32) {
    %c0_i32 = arith.constant 0 : i32
    %c0_i32_0 = arith.constant 0 : i32
    return %arg0, %c0_i32 : i32, i32
  }
  func.func @transform_1(%arg0: i32) -> (i32, i32, i32) {
    %c0_i32 = arith.constant 0 : i32
    %c0_i32_0 = arith.constant 0 : i32
    %c0_i32_1 = arith.constant 0 : i32
    return %arg0, %c0_i32, %c0_i32_0 : i32, i32, i32
  }
  func.func @transform_2(%arg0: i32) -> (i32, i32) {
    %c0_i32 = arith.constant 0 : i32
    %c0_i32_0 = arith.constant 0 : i32
    %c0_i32_1 = arith.constant 0 : i32
    return %c0_i32, %c0_i32_0 : i32, i32
  }
  func.func @transform_3(%arg0: i32) -> (i32, i32) {
    %c0_i32 = arith.constant 0 : i32
    %c0_i32_0 = arith.constant 0 : i32
    %c0_i32_1 = arith.constant 0 : i32
    return %c0_i32, %c0_i32_0 : i32, i32
  }
  func.func @transform_4(%arg0: i32) -> (i32, i32) {
    %c0_i32 = arith.constant 0 : i32
    %c0_i32_0 = arith.constant 0 : i32
    %c0_i32_1 = arith.constant 0 : i32
    return %c0_i32, %c0_i32_0 : i32, i32
  }
  func.func @transform_5(%arg0: i32) -> (i32, i32) {
    %c0_i32 = arith.constant 0 : i32
    %c0_i32_0 = arith.constant 0 : i32
    %c0_i32_1 = arith.constant 0 : i32
    return %c0_i32, %c0_i32_0 : i32, i32
  }
  func.func @transform_6(%arg0: i32) -> (i32, i32) {
    %c0_i32 = arith.constant 0 : i32
    %c0_i32_0 = arith.constant 0 : i32
    return %arg0, %c0_i32 : i32, i32
  }
  func.func @transform_7(%arg0: i32) -> (i32, i32) {
    %c0_i32 = arith.constant 0 : i32
    %c0_i32_0 = arith.constant 0 : i32
    return %arg0, %c0_i32 : i32, i32
  }
}

</mosaic_0001>

<bundles_post_ra>
// kernel: tpu_custom_call.1
= control target key start
LH: loop header
LB: loop body
LE: loop exit
PB: predicated region body
PF: predicated region fallthrough
CT: control target
= control target key end

     0   :  { %13 = vsyncpa [#allocation3], 0  ;;  %s2090_s0 = inlined_call_operand.hbm [shape: f32[2,128], index: 0, kind: input, shape index: {}]   ;;  %s2091_s1 = inlined_call_operand.hbm [shape: f32[2,128,128], index: 1, kind: input, shape index: {}]   ;;  %s2092_s2 = inlined_call_operand.hbm [shape: f32[128,128], index: 2, kind: input, shape index: {}]   ;;  %s2093_s3 = inlined_call_operand.hbm [shape: f32[128,128], index: 3, kind: input, shape index: {}]   ;;  %s2094_s4 = inlined_call_operand.vmem [shape: f32[1,128], index: 4, kind: input, shape index: {}]   ;;  %s2095_s5 = inlined_call_operand.vmem [shape: f32[1,128], index: 5, kind: input, shape index: {}]   ;;  %s2096_s6 = inlined_call_operand.hbm [shape: f32[2,128], index: 6, kind: output, shape index: {0}]   ;;  %s2097_s7 = inlined_call_operand.hbm [shape: f32[2,128], index: 7, kind: output, shape index: {1}]  }
   0x1   :  { %14 = vsyncpa [#allocation6], 0 }
   0x2   :  { %15 = vsyncpa [#allocation9], 0 }
   0x3   :  { %16 = vsyncpa [#allocation4], 0 }
   0x4   :  { %17 = vsyncpa [#allocation12], 0  ;;  %s1615_s24 = smov [#allocation5]   ;;  %s1473_s28 = scalar_lea.hbm %s2091_s1, 4096 }
   0x5   :  { %s33_s25 = sshll.u32 %s1615_s24, 4  ;;  %p1474_p0 = scmp.ne.s32.totalorder %s2091_s1, %s1473_s28  ;;  %s34_s25 = int_to_ptr.vmem [resolvable:$true] %s33_s25 }
   0x6   :  { %p1477_p1 = scmp.lt.u32.totalorder %s1473_s28, %s2091_s1 }
   0x8   :  { %p1479_p2 = pnand %p1477_p1, %p1474_p0 }
   0xa   :  { %1482 = shalt.err (!%p1479_p2)
}
   0xb   :  { %s1483_s10 = scalar_lea.vmem %s34_s25, 4096  ;;  %p1488_p4 = scmp.lt.s32.totalorder %s34_s25, %s34_s25 }
   0xc   :  { %p1484_p3 = scmp.ne.s32.totalorder %s34_s25, %s1483_s10  ;;  %p1489_p5 = scmp.lt.s32.totalorder %s1483_s10, %s1483_s10 }
   0xe   :  { %p1490_p6 = por %p1489_p5, %p1488_p4 }
  0x10   :  { %p1491_p7 = pnand %p1490_p6, %p1484_p3 }
  0x12   :  { %1494 = shalt.err (!%p1491_p7)
}
  0x13   :  { %s1616_s11 = smov 128   ;;  %s1617_s12 = smov 8  }
  0x14   :  { %39 = dma.hbm_to_vmem [thread:$0]  %s2091_s1, 4096, %s34_s25, [#allocation6], %s1616_s11, %s1616_s11, %s1617_s12  }
  0x15   :  { %s1618_s15 = smov [#allocation2]   ;;  %s1619_s17 = smov [#allocation7]  }
  0x16   :  { %s24_s16 = sshll.u32 %s1618_s15, 4  ;;  %s45_s18 = sshll.u32 %s1619_s17, 4  ;;  %s25_s16 = int_to_ptr.vmem [resolvable:$true] %s24_s16  ;;  %s46_s18 = int_to_ptr.vmem [resolvable:$true] %s45_s18 }
  0x17   :  { %s1495_s21 = scalar_lea.hbm %s2090_s0, 32 }
  0x18   :  { %p1496_p8 = scmp.ne.s32.totalorder %s2090_s0, %s1495_s21  ;;  %p1499_p9 = scmp.lt.u32.totalorder %s1495_s21, %s2090_s0 }
  0x1a   :  { %p1501_p10 = pnand %p1499_p9, %p1496_p8 }
  0x1c   :  { %1504 = shalt.err (!%p1501_p10)
}
  0x1d   :  { %s1505_s1 = scalar_lea.vmem %s25_s16, 32  ;;  %p1510_p12 = scmp.lt.s32.totalorder %s25_s16, %s25_s16 }
  0x1e   :  { %p1506_p11 = scmp.ne.s32.totalorder %s25_s16, %s1505_s1  ;;  %p1511_p13 = scmp.lt.s32.totalorder %s1505_s1, %s1505_s1 }
  0x20   :  { %p1512_p0 = por %p1511_p13, %p1510_p12 }
  0x22   :  { %p1513_p1 = pnand %p1512_p0, %p1506_p11 }
  0x24   :  { %1516 = shalt.err (!%p1513_p1)
}
  0x25   :  { %27 = dma.hbm_to_vmem [thread:$0]  %s2090_s0, 32, %s25_s16, [#allocation3]  }
  0x26   :  { %s1517_s30 = scalar_lea.hbm %s2092_s2, 2048 }
  0x27   :  { %p1518_p2 = scmp.ne.s32.totalorder %s2092_s2, %s1517_s30  ;;  %p1521_p3 = scmp.lt.u32.totalorder %s1517_s30, %s2092_s2 }
  0x29   :  { %p1523_p4 = pnand %p1521_p3, %p1518_p2 }
  0x2b   :  { %1526 = shalt.err (!%p1523_p4)
}
  0x2c   :  { %s1527_s14 = scalar_lea.vmem %s46_s18, 2048  ;;  %p1532_p6 = scmp.lt.s32.totalorder %s46_s18, %s46_s18 }
  0x2d   :  { %p1528_p5 = scmp.ne.s32.totalorder %s46_s18, %s1527_s14  ;;  %p1533_p7 = scmp.lt.s32.totalorder %s1527_s14, %s1527_s14 }
  0x2f   :  { %p1534_p8 = por %p1533_p7, %p1532_p6 }
  0x31   :  { %p1535_p9 = pnand %p1534_p8, %p1528_p5 }
  0x33   :  { %1538 = shalt.err (!%p1535_p9)
}
  0x34   :  { %51 = dma.hbm_to_vmem [thread:$0]  %s2092_s2, 2048, %s46_s18, [#allocation6], %s1616_s11, %s1616_s11, %s1617_s12  }
  0x35   :  { %s1620_s16 = smov [#allocation8]   ;;  %s1539_s21 = scalar_lea.hbm %s2093_s3, 2048 }
  0x36   :  { %s57_s17 = sshll.u32 %s1620_s16, 4  ;;  %p1540_p10 = scmp.ne.s32.totalorder %s2093_s3, %s1539_s21  ;;  %s58_s17 = int_to_ptr.vmem [resolvable:$true] %s57_s17 }
  0x37   :  { %p1543_p11 = scmp.lt.u32.totalorder %s1539_s21, %s2093_s3 }
  0x39   :  { %p1545_p12 = pnand %p1543_p11, %p1540_p10 }
  0x3b   :  { %1548 = shalt.err (!%p1545_p12)
}
  0x3c   :  { %s1549_s1 = scalar_lea.vmem %s58_s17, 2048  ;;  %p1554_p0 = scmp.lt.s32.totalorder %s58_s17, %s58_s17 }
  0x3d   :  { %p1550_p13 = scmp.ne.s32.totalorder %s58_s17, %s1549_s1  ;;  %p1555_p1 = scmp.lt.s32.totalorder %s1549_s1, %s1549_s1 }
  0x3f   :  { %p1556_p2 = por %p1555_p1, %p1554_p0 }
  0x41   :  { %p1557_p3 = pnand %p1556_p2, %p1550_p13 }
  0x43   :  { %1560 = shalt.err (!%p1557_p3)
}
  0x44   :  { %63 = dma.hbm_to_vmem [thread:$0]  %s2093_s3, 2048, %s58_s17, [#allocation9], %s1616_s11, %s1616_s11, %s1617_s12  }
  0x45   :  { %1605 = dma.done.wait [#allocation3], 32  }
  0x46   :  { %1606 = vsyncadd [#allocation3], 4294967264 }
  0x47   :  { %1607 = dma.done.wait [#allocation6], 6144  }
  0x48   :  { %1608 = vsyncadd [#allocation6], 4294961152 }
  0x49   :  { %1609 = dma.done.wait [#allocation9], 2048  }
  0x4a   :  { %1610 = vsyncadd [#allocation9], 4294965248  ;;  %v1621_v0 = vmov 0.0|0.0   ;;  %vm1622_vm0 = vmmov 0   ;;  %v1623_v1 = vmov 0.0   ;;  %v113_v2 = vld [vmem:[#allocation7] sm:$0xff] }
  0x4b   :  { %1313 = vmatprep.subr.bf16.mxu0 %v1621_v0  ;;  %1230 = vmatprep.mubr.msk.f32.mxu0 %vm1622_vm0, %v1623_v1  ;;  %v114_v3 = vld [vmem:[#allocation7 + $0x8] sm:$0xff]  ;;  %v206_v4 = vld [vmem:[#allocation8] sm:$0xff]  ;;  %v115_v7 = vld [vmem:[#allocation7 + $0x10] sm:$0xff]  ;;  %vm691_vm1 = vcmask 130112   ;;  %vm698_vm2 = vcmask 195712   ;;  %vm705_vm3 = vcmask 261312  }
  0x4c   :  { %v1314_v5 = vpack.c.bf16 %v114_v3, %v113_v2  ;;  %v207_v6 = vld [vmem:[#allocation8 + $0x8] sm:$0xff]  ;;  %v116_v8 = vld [vmem:[#allocation7 + $0x18] sm:$0xff]  ;;  %v208_v10 = vld [vmem:[#allocation8 + $0x10] sm:$0xff]  ;;  %vm712_vm4 = vcmask 326912   ;;  %vm719_vm5 = vcmask 392512   ;;  %vm726_vm6 = vcmask 458112  }
  0x4d   :  { %v1725_v9 = vpack.c.bf16 %v207_v6, %v206_v4  ;;  %v209_v11 = vld [vmem:[#allocation8 + $0x18] sm:$0xff]  ;;  %v1317_v12 = vpack.c.bf16 %v116_v8, %v115_v7  ;;  %v210_v14 = vld [vmem:[#allocation8 + $0x20] sm:$0xff]  ;;  %v211_v15 = vld [vmem:[#allocation8 + $0x28] sm:$0xff]  ;;  %vm733_vm7 = vcmask 523712   ;;  %vm740_vm8 = vcmask 589312  }
  0x4e   :  { %1315 = vmatpush3.bf16.msra.mxu0 %v1314_v5  ;;  %v1727_v13 = vpack.c.bf16 %v209_v11, %v208_v10  ;;  %v117_v16 = vld [vmem:[#allocation7 + $0x20] sm:$0xff]  ;;  %v118_v17 = vld [vmem:[#allocation7 + $0x28] sm:$0xff]  ;;  %v1733_v18 = vpack.c.bf16 %v211_v15, %v210_v14  ;;  %v212_v20 = vld [vmem:[#allocation8 + $0x30] sm:$0xff]  ;;  %vm747_vm9 = vcmask 654912   ;;  %vm754_vm10 = vcmask 720512  }
  0x4f   :  { %1369 = vmatprep.subr.bf16.mxu1 %v1725_v9  ;;  %1316 = vmatprep.subr.bf16.mxu0 %v1621_v0  ;;  %v1320_v19 = vpack.c.bf16 %v118_v17, %v117_v16  ;;  %v213_v21 = vld [vmem:[#allocation8 + $0x38] sm:$0xff]  ;;  %v119_v22 = vld [vmem:[#allocation7 + $0x30] sm:$0xff]  ;;  %v214_v26 = vld [vmem:[#allocation8 + $0x40] sm:$0xff]  ;;  %vm761_vm11 = vcmask 786112   ;;  %vm768_vm12 = vcmask 851712   ;;  %vm775_vm13 = vcmask 917312  }
  0x50   :  { %1377 = vmatpush3.bf16.msra.mxu1 %v1725_v9  ;;  %v120_v23 = vld [vmem:[#allocation7 + $0x38] sm:$0xff]  ;;  %v1738_v24 = vpack.c.bf16 %v213_v21, %v212_v20  ;;  %v215_v27 = vld [vmem:[#allocation8 + $0x48] sm:$0xff]  ;;  %v89_v28 = vld [vmem:[#allocation5 + $0x40] sm:$0xff]  ;;  %v451_v21 = vlaneseq  ;;  %vm782_vm14 = vcmask 982912   ;;  %vm789_vm15 = vcmask 1048512  }
  0x51   :  { %1370 = vmatprep.subr.bf16.mxu1 %v1727_v13  ;;  %v1323_v25 = vpack.c.bf16 %v120_v23, %v119_v22  ;;  %v121_v29 = vld [vmem:[#allocation7 + $0x40] sm:$0xff]  ;;  %v122_v30 = vld [vmem:[#allocation7 + $0x48] sm:$0xff]  ;;  %1277 = vmatprep.mubr.f32.mxu1 %v89_v28  ;;  %v1743_v31 = vpack.c.bf16 %v215_v27, %v214_v26  ;;  %v216_v33 = vld [vmem:[#allocation8 + $0x50] sm:$0xff]  ;;  %vm870_vm0 = vcmask 1041409  }
  0x52   :  { %1318 = vmatpush3.bf16.msra.mxu0 %v1317_v12  ;;  %v1326_v32 = vpack.c.bf16 %v122_v30, %v121_v29  ;;  %v217_v34 = vld [vmem:[#allocation8 + $0x58] sm:$0xff]  ;;  %v123_v35 = vld [vmem:[#allocation7 + $0x50] sm:$0xff]  ;;  %v218_v39 = vld [vmem:[#allocation8 + $0x60] sm:$0xff]  ;;  %v1841_v23 = vshrl.u32 %v451_v21, 7 }
  0x53   :  { %1319 = vmatprep.subr.bf16.mxu0 %v1621_v0  ;;  %v124_v36 = vld [vmem:[#allocation7 + $0x58] sm:$0xff]  ;;  %v1748_v37 = vpack.c.bf16 %v217_v34, %v216_v33  ;;  %v219_v40 = vld [vmem:[#allocation8 + $0x68] sm:$0xff]  ;;  %v125_v41 = vld [vmem:[#allocation7 + $0x60] sm:$0xff] }
  0x54   :  { %1378 = vmatpush3.bf16.msra.mxu1 %v1727_v13  ;;  %v1329_v38 = vpack.c.bf16 %v124_v36, %v123_v35  ;;  %v126_v42 = vld [vmem:[#allocation7 + $0x68] sm:$0xff]  ;;  %v1361_v43 = vpack.c.bf16 %v219_v40, %v218_v39  ;;  %v220_v45 = vld [vmem:[#allocation8 + $0x70] sm:$0xff]  ;;  %v221_v46 = vld [vmem:[#allocation8 + $0x78] sm:$0xff] }
  0x55   :  { %1371 = vmatprep.subr.bf16.mxu1 %v1733_v18  ;;  %v1332_v44 = vpack.c.bf16 %v126_v42, %v125_v41  ;;  %v127_v47 = vld [vmem:[#allocation7 + $0x70] sm:$0xff]  ;;  %v128_v48 = vld [vmem:[#allocation7 + $0x78] sm:$0xff]  ;;  %v1365_v49 = vpack.c.bf16 %v221_v46, %v220_v45  ;;  %v1757_v52 = vld [vmem:[#allocation5] sm:$0xff] }
  0x56   :  { %1321 = vmatpush3.bf16.msra.mxu0 %v1320_v19  ;;  %v1335_v50 = vpack.c.bf16 %v128_v48, %v127_v47  ;;  %v80_v51 = vld [vmem:[#allocation2] sm:$0x3]  ;;  %v90_v53 = vld [vmem:[#allocation5 + $0x48] sm:$0xff]  ;;  %v91_v54 = vld [vmem:[#allocation5 + $0x50] sm:$0xff]  ;;  %v1624_v19 = vmov 1966171168  }
  0x57   :  { %1322 = vmatprep.subr.bf16.mxu0 %v1621_v0  ;;  %v92_v55 = vld [vmem:[#allocation5 + $0x58] sm:$0xff]  ;;  %v93_v56 = vld [vmem:[#allocation5 + $0x60] sm:$0xff]  ;;  %v94_v57 = vld [vmem:[#allocation5 + $0x68] sm:$0xff]  ;;  %v449_v20 = vunpack.c.l.s4 %v1624_v19 }
  0x58   :  { %1379 = vmatpush3.bf16.msra.mxu1 %v1733_v18  ;;  %v95_v58 = vld [vmem:[#allocation5 + $0x70] sm:$0xff]  ;;  %v96_v59 = vld [vmem:[#allocation5 + $0x78] sm:$0xff]  ;;  %v1766_v60 = vld [vmem:[#allocation5 + $0x80] sm:$0xff] }
  0x59   :  { %1372 = vmatprep.subr.bf16.mxu1 %v1738_v24  ;;  %v1771_v61 = vld [vmem:[#allocation5 + $0x88] sm:$0xff]  ;;  %v1773_v62 = vld [vmem:[#allocation5 + $0x90] sm:$0xff]  ;;  %v1779_v63 = vld [vmem:[#allocation5 + $0x98] sm:$0xff]  ;;  %v450_v22 = vunpack.c.0.s8 %v449_v20 }
  0x5a   :  { %1324 = vmatpush3.bf16.msra.mxu0 %v1323_v25  ;;  %v1786_v1 = vld [vmem:[#allocation5 + $0xa8] sm:$0xff]  ;;  %v1788_v2 = vld [vmem:[#allocation5 + $0xb0] sm:$0xff]  ;;  %v1792_v3 = vld [vmem:[#allocation5 + $0xb8] sm:$0xff] }
  0x5b   :  { %1325 = vmatprep.subr.bf16.mxu0 %v1621_v0  ;;  %v1794_v4 = vld [vmem:[#allocation5 + $0xc0] sm:$0xff]  ;;  %v1796_v5 = vld [vmem:[#allocation5 + $0x8] sm:$0xff]  ;;  %v1799_v6 = vld [vmem:[#allocation5 + $0x10] sm:$0xff]  ;;  %v453_v25 = vsub.s32 %v450_v22, %v1841_v23 }
  0x5c   :  { %1380 = vmatpush3.bf16.msra.mxu1 %v1738_v24  ;;  %v1802_v7 = vld [vmem:[#allocation5 + $0xc8] sm:$0xff]  ;;  %v1805_v8 = vld [vmem:[#allocation5 + $0xd0] sm:$0xff]  ;;  %v1811_v10 = vld [vmem:[#allocation5 + $0x20] sm:$0xff] }
  0x5d   :  { %1373 = vmatprep.subr.bf16.mxu1 %v1743_v31  ;;  %v1814_v11 = vld [vmem:[#allocation5 + $0xd8] sm:$0xff]  ;;  %v1817_v12 = vld [vmem:[#allocation5 + $0xe0] sm:$0xff]  ;;  %v1823_v14 = vld [vmem:[#allocation5 + $0x30] sm:$0xff] }
  0x5e   :  { %1327 = vmatpush3.bf16.msra.mxu0 %v1326_v32  ;;  %v1826_v15 = vld [vmem:[#allocation5 + $0xe8] sm:$0xff]  ;;  %v1829_v16 = vld [vmem:[#allocation5 + $0xf0] sm:$0xff]  ;;  %v1832_v17 = vld [vmem:[#allocation5 + $0x38] sm:$0xff] }
  0x5f   :  { %1328 = vmatprep.subr.bf16.mxu0 %v1621_v0 }
  0x60   :  { %1381 = vmatpush3.bf16.msra.mxu1 %v1743_v31 }
  0x61   :  { %1374 = vmatprep.subr.bf16.mxu1 %v1748_v37 }
  0x62   :  { %1330 = vmatpush3.bf16.msra.mxu0 %v1329_v38 }
  0x63   :  { %1331 = vmatprep.subr.bf16.mxu0 %v1621_v0 }
  0x64   :  { %1382 = vmatpush3.bf16.msra.mxu1 %v1748_v37 }
  0x65   :  { %1375 = vmatprep.subr.bf16.mxu1 %v1361_v43 }
  0x66   :  { %1333 = vmatpush3.bf16.msra.mxu0 %v1332_v44 }
  0x67   :  { %1334 = vmatprep.subr.bf16.mxu0 %v1621_v0  ;;  %v1781_v0 = vld [vmem:[#allocation5 + $0xa0] sm:$0xff] }
  0x68   :  { %1383 = vmatpush3.bf16.msra.mxu1 %v1361_v43 }
  0x69   :  { %1376 = vmatprep.subr.bf16.mxu1 %v1365_v49 }
  0x6a   :  { %1336 = vmatpush3.bf16.msra.mxu0 %v1335_v50 }
  0x6b   :  { %1338 = vmatprep.subr.bf16.mxu0 %v1725_v9 }
  0x6c   :  { %1384 = vmatpush3.bf16.msra.mxu1 %v1365_v49 }
  0x6d   :  { %1231 = vmatmul.mubr.f32.vlgmr.msra.gmra.mrb[0].mxu0 %v80_v51 }
  0x6e   :  { %1340 = vmatpush3.bf16.msra.mxu0 %v1725_v9  ;;  %1265 = vmatprep.mubr.f32.mxu0 %v1757_v52  ;;  %v1808_v9 = vld [vmem:[#allocation5 + $0x18] sm:$0xff] }
  0x6f   :  { %1278 = vmatmul.mubr.f32.vlgmr.msra.gmra.mrb[0].mxu1 %v90_v53  ;;  %1342 = vmatprep.subr.bf16.mxu0 %v1727_v13 }
  0x70   :  { %1280 = vmatprep.mubr.f32.mxu1 %v91_v54 }
  0x72   :  { %1344 = vmatpush3.bf16.msra.mxu0 %v1727_v13  ;;  %v1820_v13 = vld [vmem:[#allocation5 + $0x28] sm:$0xff] }
  0x73   :  { %1281 = vmatmul.mubr.f32.gmra.mrb[2].mxu1 %v92_v55  ;;  %1346 = vmatprep.subr.bf16.mxu0 %v1733_v18 }
  0x74   :  { %1283 = vmatprep.mubr.f32.mxu1 %v93_v56 }
  0x76   :  { %1348 = vmatpush3.bf16.msra.mxu0 %v1733_v18  ;;  %v1836_v18 = vld [vmem:[#allocation5 + $0xf8] sm:$0xff] }
  0x77   :  { %1284 = vmatmul.mubr.f32.gmra.mrb[4].mxu1 %v94_v57  ;;  %1350 = vmatprep.subr.bf16.mxu0 %v1738_v24  ;;  %2099 = vst [vmem:[#allocation18_spill] sm:$0xff] %v1836_v18  ;;  %v1875_v57 = vld [vmem:[%s2095_s5] ss:$0 sm:$0xff]  ;;  %s1625_s5 = smov [#allocation11]  }
  0x78   :  { %1286 = vmatprep.mubr.f32.mxu1 %v95_v58  ;;  %s1116_s25 = sshll.u32 %s1625_s5, 4  ;;  %s1117_s25 = int_to_ptr.vmem [resolvable:$true] %s1116_s25 }
  0x79   :  { %s1561_s27 = scalar_lea.vmem %s1117_s25, 32  ;;  %p1566_p5 = scmp.lt.s32.totalorder %s1117_s25, %s1117_s25 }
  0x7a   :  { %1352 = vmatpush3.bf16.msra.mxu0 %v1738_v24  ;;  %v1131_v24 = vld [vmem:[%s2094_s4] ss:$0 sm:$0xff]  ;;  %p1562_p4 = scmp.ne.s32.totalorder %s1117_s25, %s1561_s27  ;;  %p1567_p6 = scmp.lt.s32.totalorder %s1561_s27, %s1561_s27 }
  0x7b   :  { %1287 = vmatmul.mubr.f32.gmra.mrb[6].mxu1 %v96_v59  ;;  %1354 = vmatprep.subr.bf16.mxu0 %v1743_v31 }
  0x7c   :  { %1289 = vmatprep.mubr.f32.mxu1 %v1766_v60  ;;  %p1568_p7 = por %p1567_p6, %p1566_p5 }
  0x7e   :  { %1356 = vmatpush3.bf16.msra.mxu0 %v1743_v31  ;;  %v1848_v31 = vsub.s32 0, %v1841_v23  ;;  %p1569_p8 = pnand %p1568_p7, %p1562_p4 }
  0x7f   :  { %1290 = vmatmul.mubr.f32.gmra.mrb[8].mxu1 %v1771_v61  ;;  %1358 = vmatprep.subr.bf16.mxu0 %v1748_v37 }
  0x80   :  { %1292 = vmatprep.mubr.f32.mxu1 %v1773_v62 }
  0x82   :  { %1360 = vmatpush3.bf16.msra.mxu0 %v1748_v37 }
  0x83   :  { %1293 = vmatmul.mubr.f32.gmra.mrb[10].mxu1 %v1779_v63  ;;  %1362 = vmatprep.subr.bf16.mxu0 %v1361_v43 }
  0x84   :  { %1295 = vmatprep.mubr.f32.mxu1 %v1781_v0 }
  0x86   :  { %1364 = vmatpush3.bf16.msra.mxu0 %v1361_v43 }
  0x87   :  { %1296 = vmatmul.mubr.f32.gmra.mrb[12].mxu1 %v1786_v1  ;;  %1366 = vmatprep.subr.bf16.mxu0 %v1365_v49 }
  0x88   :  { %1298 = vmatprep.mubr.f32.mxu1 %v1788_v2 }
  0x8a   :  { %1368 = vmatpush3.bf16.msra.mxu0 %v1365_v49 }
  0x8b   :  { %1299 = vmatmul.mubr.f32.gmra.mrb[14].mxu1 %v1792_v3 }
  0x8c   :  { %1301 = vmatprep.mubr.f32.mxu1 %v1794_v4 }
  0x8d   :  { %1266 = vmatmul.mubr.f32.vlgmr.msra.gmra.mrb[2].mxu0 %v1796_v5 }
  0x8e   :  { %1268 = vmatprep.mubr.f32.mxu0 %v1799_v6 }
  0x8f   :  { %1302 = vmatmul.mubr.f32.gmra.mrb[16].mxu1 %v1802_v7 }
  0x90   :  { %1304 = vmatprep.mubr.f32.mxu1 %v1805_v8 }
  0x91   :  { %1269 = vmatmul.mubr.f32.gmra.mrb[4].mxu0 %v1808_v9 }
  0x92   :  { %1271 = vmatprep.mubr.f32.mxu0 %v1811_v10 }
  0x93   :  { %1305 = vmatmul.mubr.f32.gmra.mrb[18].mxu1 %v1814_v11 }
  0x94   :  { %1307 = vmatprep.mubr.f32.mxu1 %v1817_v12 }
  0x95   :  { %1272 = vmatmul.mubr.f32.gmra.mrb[6].mxu0 %v1820_v13 }
  0x96   :  { %1274 = vmatprep.mubr.f32.mxu0 %v1823_v14 }
  0x97   :  { %1308 = vmatmul.mubr.f32.gmra.mrb[20].mxu1 %v1826_v15 }
  0x98   :  { %1310 = vmatprep.mubr.f32.mxu1 %v1829_v16 }
  0x99   :  { %1275 = vmatmul.mubr.f32.gmra.mrb[8].mxu0 %v1832_v17 }
  0x9b   :  { %1311 = vmatmul.mubr.f32.gmra.mrb[22].mxu1 %v1836_v18 }
 0x140   :  { %v202_v26 = vpop.f32.mrb[0].mxu0 }
 0x141   :  { %v203_v27 = vadd.f32 %v1131_v24, %v202_v26  ;;  %v1232_v28 = vpop.f32.mrb[1].mxu0 }
 0x142   :  { %v1279_v29 = vpop.f32.mrb[0].mxu1 }
 0x143   :  { %v454_v30 = vrot.slane %v203_v27, %v453_v25  ;;  %v328_v32 = vpop.f32.mrb[1].mxu1 }
 0x145   :  { %v462_v33 = vrot.slane %v454_v30, %v453_v25  ;;  %v455_v35 = vcombine.high %v454_v30, %v454_v30 }
 0x146   :  { %v1282_v34 = vpop.f32.mrb[2].mxu1 }
 0x147   :  { %v1851_v36 = vrot.slane %v462_v33, %v1848_v31  ;;  %v338_v37 = vpop.f32.mrb[3].mxu1  ;;  %v469_v43 = vrot.slane %v455_v35, %v453_v25 }
 0x149   :  { %v489_v38 = vadd.f32 %v1279_v29, %v1851_v36  ;;  %v488_v39 = vadd.f32 %v1851_v36, %v328_v32  ;;  %v491_v40 = vadd.f32 %v1282_v34, %v1851_v36  ;;  %v490_v41 = vadd.f32 %v1851_v36, %v338_v37 }
 0x14a   :  { %v1285_v42 = vpop.f32.mrb[4].mxu1  ;;  %v1862_v48 = vrot.slane %v469_v43, %v1848_v31 }
 0x14b   :  { %v1858_v44 = vadd.f32 %v1285_v42, %v1851_v36  ;;  %v348_v45 = vpop.f32.mrb[5].mxu1  ;;  %1397 = vtanh.f32 %v488_v39 }
 0x14c   :  { %v492_v46 = vadd.f32 %v1851_v36, %v348_v45  ;;  %1399 = vtanh.f32 %v489_v38 }
 0x14d   :  { %1401 = vtanh.f32 %v490_v41 }
 0x14e   :  { %v1288_v47 = vpop.f32.mrb[6].mxu1 }
 0x14f   :  { %v1865_v49 = vadd.f32 %v1288_v47, %v1851_v36  ;;  %v358_v50 = vpop.f32.mrb[7].mxu1 }
 0x150   :  { %v1868_v51 = vadd.f32 %v1851_v36, %v358_v50 }
 0x152   :  { %v1291_v53 = vpop.f32.mrb[8].mxu1 }
 0x153   :  { %v497_v54 = vadd.f32 %v1291_v53, %v1862_v48  ;;  %v368_v55 = vpop.f32.mrb[9].mxu1 }
 0x154   :  { %v496_v56 = vadd.f32 %v1862_v48, %v368_v55 }
 0x155   :  { %1403 = vtanh.f32 %v497_v54  ;;  %v1398_v58 = vpop.eup %1397 }
 0x156   :  { %1405 = vtanh.f32 %v491_v40  ;;  %v1294_v59 = vpop.f32.mrb[10].mxu1  ;;  %v559_v22 = vmul.f32 %v1398_v58, %v1875_v57  ;;  %v1400_v24 = vpop.eup %1399 }
 0x157   :  { %1407 = vtanh.f32 %v496_v56  ;;  %v499_v19 = vadd.f32 %v1294_v59, %v1862_v48  ;;  %v378_v20 = vpop.f32.mrb[11].mxu1  ;;  %v560_v29 = vmul.f32 %v1400_v24, %v1875_v57  ;;  %v1402_v30 = vpop.eup %1401 }
 0x158   :  { %v498_v25 = vadd.f32 %v1862_v48, %v378_v20  ;;  %599 = vadd.xlane.f32.xlu0 %v559_v22  ;;  %1409 = vtanh.f32 %v492_v46  ;;  %v561_v38 = vmul.f32 %v1402_v30, %v1875_v57 }
 0x159   :  { %1411 = vtanh.f32 %v499_v19 }
 0x15a   :  { %v1297_v26 = vpop.f32.mrb[12].mxu1  ;;  %1413 = vtanh.f32 %v498_v25 }
 0x15b   :  { %v501_v27 = vadd.f32 %v1297_v26, %v1862_v48  ;;  %v388_v28 = vpop.f32.mrb[13].mxu1 }
 0x15c   :  { %v500_v32 = vadd.f32 %v1862_v48, %v388_v28  ;;  %601 = vadd.xlane.f32.xlu0 %v560_v29 }
 0x15d   :  { %1415 = vtanh.f32 %v501_v27 }
 0x15e   :  { %v1300_v33 = vpop.f32.mrb[14].mxu1 }
 0x15f   :  { %v1404_v34 = vpop.eup %1403  ;;  %v503_v35 = vadd.f32 %v1300_v33, %v1862_v48  ;;  %v398_v37 = vpop.f32.mrb[15].mxu1 }
 0x160   :  { %v1406_v39 = vpop.eup %1405  ;;  %v502_v40 = vadd.f32 %v1862_v48, %v398_v37  ;;  %v1267_v41 = vpop.f32.mrb[2].mxu0  ;;  %v568_v42 = vmul.f32 %v1404_v34, %v1875_v57  ;;  %603 = vadd.xlane.f32.xlu0 %v561_v38 }
 0x161   :  { %v1408_v43 = vpop.eup %1407  ;;  %v481_v45 = vadd.f32 %v1267_v41, %v1851_v36  ;;  %v288_v46 = vpop.f32.mrb[3].mxu0  ;;  %v562_v55 = vmul.f32 %v1406_v39, %v1875_v57 }
 0x162   :  { %v1303_v47 = vpop.f32.mrb[16].mxu1  ;;  %617 = vadd.xlane.f32.xlu1 %v568_v42  ;;  %v480_v50 = vadd.f32 %v1851_v36, %v288_v46  ;;  %v1410_v56 = vpop.eup %1409  ;;  %v567_v19 = vmul.f32 %v1408_v43, %v1875_v57 }
 0x163   :  { %1417 = vtanh.f32 %v481_v45  ;;  %v505_v53 = vadd.f32 %v1303_v47, %v1862_v48  ;;  %v408_v54 = vpop.f32.mrb[17].mxu1  ;;  %v1412_v20 = vpop.eup %1411  ;;  %v563_v29 = vmul.f32 %v1410_v56, %v1875_v57 }
 0x164   :  { %v504_v58 = vadd.f32 %v1862_v48, %v408_v54  ;;  %v1270_v59 = vpop.f32.mrb[4].mxu0  ;;  %1419 = vtanh.f32 %v480_v50  ;;  %605 = vadd.xlane.f32.xlu0 %v562_v55  ;;  %v570_v34 = vmul.f32 %v1412_v20, %v1875_v57  ;;  %v1414_v37 = vpop.eup %1413 }
 0x165   :  { %v483_v22 = vadd.f32 %v1270_v59, %v1851_v36  ;;  %v298_v24 = vpop.f32.mrb[5].mxu0  ;;  %1421 = vtanh.f32 %v500_v32  ;;  %v569_v50 = vmul.f32 %v1414_v37, %v1875_v57 }
 0x166   :  { %v1306_v25 = vpop.f32.mrb[18].mxu1  ;;  %615 = vadd.xlane.f32.xlu1 %v567_v19  ;;  %v482_v26 = vadd.f32 %v1851_v36, %v298_v24 }
 0x167   :  { %v507_v27 = vadd.f32 %v1306_v25, %v1862_v48  ;;  %v418_v28 = vpop.f32.mrb[19].mxu1  ;;  %1423 = vtanh.f32 %v483_v22  ;;  %v1416_v45 = vpop.eup %1415 }
 0x168   :  { %v1898_v30 = vadd.f32 %v1862_v48, %v418_v28  ;;  %v1273_v33 = vpop.f32.mrb[6].mxu0  ;;  %607 = vadd.xlane.f32.xlu0 %v563_v29  ;;  %1425 = vtanh.f32 %v503_v35 }
 0x169   :  { %v485_v38 = vadd.f32 %v1273_v33, %v1851_v36  ;;  %v308_v39 = vpop.f32.mrb[7].mxu0  ;;  %1427 = vtanh.f32 %v482_v26  ;;  %v572_v26 = vmul.f32 %v1416_v45, %v1875_v57 }
 0x16a   :  { %v1309_v41 = vpop.f32.mrb[20].mxu1  ;;  %621 = vadd.xlane.f32.xlu1 %v570_v34  ;;  %v484_v32 = vadd.f32 %v1851_v36, %v308_v39  ;;  %1429 = vtanh.f32 %v502_v40 }
 0x16b   :  { %v1904_v42 = vadd.f32 %v1309_v41, %v1862_v48  ;;  %v428_v43 = vpop.f32.mrb[21].mxu1  ;;  %1431 = vtanh.f32 %v485_v38 }
 0x16c   :  { %v508_v46 = vadd.f32 %v1862_v48, %v428_v43  ;;  %v1276_v47 = vpop.f32.mrb[8].mxu0 }
 0x16d   :  { %v1418_v54 = vpop.eup %1417  ;;  %v487_v55 = vadd.f32 %v1276_v47, %v1851_v36  ;;  %v318_v56 = vpop.f32.mrb[9].mxu0 }
 0x16e   :  { %v1312_v59 = vpop.f32.mrb[22].mxu1  ;;  %619 = vadd.xlane.f32.xlu1 %v569_v50  ;;  %v486_v19 = vadd.f32 %v1851_v36, %v318_v56  ;;  %v552_v35 = vmul.f32 %v1418_v54, %v1875_v57  ;;  %v1420_v20 = vpop.eup %1419 }
 0x16f   :  { %v511_v22 = vadd.f32 %v1312_v59, %v1862_v48  ;;  %v438_v24 = vpop.f32.mrb[23].mxu1  ;;  %v1422_v28 = vpop.eup %1421  ;;  %v551_v29 = vmul.f32 %v1420_v20, %v1875_v57 }
 0x170   :  { %v510_v25 = vadd.f32 %v1862_v48, %v438_v24  ;;  %585 = vadd.xlane.f32.xlu0 %v552_v35  ;;  %v571_v40 = vmul.f32 %v1422_v28, %v1875_v57 }
 0x171   :  { %1433 = vtanh.f32 %v511_v22  ;;  %v1424_v36 = vpop.eup %1423 }
 0x172   :  { %1435 = vtanh.f32 %v510_v25  ;;  %625 = vadd.xlane.f32.xlu1 %v572_v26  ;;  %v1426_v33 = vpop.eup %1425  ;;  %v554_v34 = vmul.f32 %v1424_v36, %v1875_v57 }
 0x173   :  { %1437 = vtanh.f32 %v505_v53  ;;  %v1428_v48 = vpop.eup %1427  ;;  %v574_v37 = vmul.f32 %v1426_v33, %v1875_v57 }
 0x174   :  { %583 = vadd.xlane.f32.xlu0 %v551_v29  ;;  %1439 = vtanh.f32 %v484_v32  ;;  %v1430_v38 = vpop.eup %1429  ;;  %v553_v41 = vmul.f32 %v1428_v48, %v1875_v57 }
 0x175   :  { %1441 = vtanh.f32 %v504_v58  ;;  %v1432_v39 = vpop.eup %1431  ;;  %v573_v32 = vmul.f32 %v1430_v38, %v1875_v57 }
 0x176   :  { %623 = vadd.xlane.f32.xlu1 %v571_v40  ;;  %1443 = vtanh.f32 %v487_v55  ;;  %v556_v50 = vmul.f32 %v1432_v39, %v1875_v57 }
 0x177   :  { %1445 = vtanh.f32 %v507_v27 }
 0x178   :  { %589 = vadd.xlane.f32.xlu0 %v554_v34  ;;  %1447 = vtanh.f32 %v486_v19 }
 0x179   :  { %1449 = vtanh.f32 %v1898_v30 }
 0x17a   :  { %629 = vadd.xlane.f32.xlu1 %v574_v37  ;;  %1451 = vtanh.f32 %v1858_v44 }
 0x17b   :  { %v1434_v53 = vpop.eup %1433  ;;  %1453 = vtanh.f32 %v508_v46 }
 0x17c   :  { %v1436_v43 = vpop.eup %1435  ;;  %587 = vadd.xlane.f32.xlu0 %v553_v41  ;;  %v582_v45 = vmul.f32 %v1434_v53, %v1875_v57  ;;  %1455 = vtanh.f32 %v1868_v51 }
 0x17d   :  { %v1438_v47 = vpop.eup %1437  ;;  %v581_v58 = vmul.f32 %v1436_v43, %v1875_v57  ;;  %1457 = vtanh.f32 %v1904_v42 }
 0x17e   :  { %627 = vadd.xlane.f32.xlu1 %v573_v32  ;;  %v1440_v54 = vpop.eup %1439  ;;  %v576_v55 = vmul.f32 %v1438_v47, %v1875_v57  ;;  %1459 = vtanh.f32 %v1865_v49 }
 0x17f   :  { %v1442_v27 = vpop.eup %1441  ;;  %v555_v56 = vmul.f32 %v1440_v54, %v1875_v57 }
 0x180   :  { %593 = vadd.xlane.f32.xlu0 %v556_v50  ;;  %v1444_v59 = vpop.eup %1443  ;;  %v575_v19 = vmul.f32 %v1442_v27, %v1875_v57 }
 0x181   :  { %v1446_v35 = vpop.eup %1445  ;;  %v558_v30 = vmul.f32 %v1444_v59, %v1875_v57 }
 0x182   :  { %633 = vadd.xlane.f32.xlu1 %v576_v55  ;;  %v1448_v20 = vpop.eup %1447  ;;  %v578_v44 = vmul.f32 %v1446_v35, %v1875_v57  ;;  %v1957_v55 = vand.u32 127, %v451_v21 }
 0x183   :  { %v1450_v22 = vpop.eup %1449  ;;  %v557_v46 = vmul.f32 %v1448_v20, %v1875_v57 }
 0x184   :  { %591 = vadd.xlane.f32.xlu0 %v555_v56  ;;  %v1452_v24 = vpop.eup %1451  ;;  %v577_v25 = vmul.f32 %v1450_v22, %v1875_v57  ;;  %v693_v56 = vadd.s32 4294967280, %v1957_v55  ;;  %v686_v59 = vadd.s32 4294967288, %v1957_v55  ;;  %v684_v35 = vsub.s32 %v1957_v55, %v1841_v23 }
 0x185   :  { %v1454_v51 = vpop.eup %1453  ;;  %v564_v26 = vmul.f32 %v1452_v24, %v1875_v57  ;;  %v700_v20 = vadd.s32 4294967272, %v1957_v55  ;;  %v707_v22 = vadd.s32 4294967264, %v1957_v55  ;;  %v728_v18 = vadd.s32 4294967240, %v1957_v55 }
 0x186   :  { %631 = vadd.xlane.f32.xlu1 %v575_v19  ;;  %v1456_v28 = vpop.eup %1455  ;;  %v579_v42 = vmul.f32 %v1454_v51, %v1875_v57  ;;  %v689_v21 = vsub.s32 %v686_v59, %v1841_v23  ;;  %v735_v51 = vadd.s32 4294967232, %v1957_v55 }
 0x187   :  { %v1458_v29 = vpop.eup %1457  ;;  %v565_v36 = vmul.f32 %v1456_v28, %v1875_v57 }
 0x188   :  { %597 = vadd.xlane.f32.xlu0 %v558_v30  ;;  %v1460_v49 = vpop.eup %1459  ;;  %v580_v40 = vmul.f32 %v1458_v29, %v1875_v57  ;;  %v703_v29 = vsub.s32 %v700_v20, %v1841_v23 }
 0x189   :  { %v566_v33 = vmul.f32 %v1460_v49, %v1875_v57  ;;  %v710_v49 = vsub.s32 %v707_v22, %v1841_v23 }
 0x18a   :  { %637 = vadd.xlane.f32.xlu1 %v578_v44  ;;  %v696_v44 = vsub.s32 %v693_v56, %v1841_v23 }
 0x18c   :  { %595 = vadd.xlane.f32.xlu0 %v557_v46 }
 0x18e   :  { %635 = vadd.xlane.f32.xlu1 %v577_v25 }
 0x190   :  { %609 = vadd.xlane.f32.xlu0 %v564_v26 }
 0x192   :  { %639 = vadd.xlane.f32.xlu1 %v579_v42 }
 0x194   :  { %611 = vadd.xlane.f32.xlu0 %v565_v36  ;;  %v714_v36 = vadd.s32 4294967256, %v1957_v55 }
 0x196   :  { %641 = vadd.xlane.f32.xlu1 %v580_v40 }
 0x198   :  { %613 = vadd.xlane.f32.xlu0 %v566_v33 }
 0x19a   :  { %643 = vadd.xlane.f32.xlu1 %v581_v58 }
 0x19e   :  { %645 = vadd.xlane.f32.xlu1 %v582_v45 }
 0x1e5   :  { %v1940_v34 = vpop.xlane.xlu0 %599 }
 0x1e9   :  { %v1942_v48 = vpop.xlane.xlu0 %601 }
 0x1ed   :  { %v1944_v37 = vpop.xlane.xlu0 %603 }
 0x1ef   :  { %v618_v38 = vpop.xlane.xlu1 %617 }
 0x1f0   :  { %v798_v59 = vrot.slane %v618_v38, %v689_v21 }
 0x1f1   :  { %v1946_v39 = vpop.xlane.xlu0 %605 }
 0x1f3   :  { %v616_v41 = vpop.xlane.xlu1 %615 }
 0x1f4   :  { %v794_v42 = vrot.slane %v616_v41, %v684_v35 }
 0x1f5   :  { %v1950_v43 = vpop.xlane.xlu0 %607 }
 0x1f7   :  { %v1948_v53 = vpop.xlane.xlu1 %621 }
 0x1fb   :  { %v620_v32 = vpop.xlane.xlu1 %619 }
 0x1fc   :  { %v803_v40 = vrot.slane %v620_v32, %v696_v44  ;;  %v799_v32 = vsel %vm691_vm1, %v798_v59, %v794_v42  ;;  %v756_v59 = vadd.s32 4294967208, %v1957_v55 }
 0x1fd   :  { %v586_v47 = vpop.xlane.xlu0 %585 }
 0x1fe   :  { %v690_v26 = vrot.slane %v586_v47, %v689_v21 }
 0x1ff   :  { %v1952_v57 = vpop.xlane.xlu1 %625 }
 0x201   :  { %v584_v58 = vpop.xlane.xlu0 %583 }
 0x202   :  { %v685_v46 = vrot.slane %v584_v58, %v684_v35  ;;  %v721_v58 = vadd.s32 4294967248, %v1957_v55  ;;  %v749_v35 = vadd.s32 4294967216, %v1957_v55 }
 0x203   :  { %v624_v45 = vpop.xlane.xlu1 %623 }
 0x204   :  { %v692_v33 = vsel %vm691_vm1, %v690_v26, %v685_v46  ;;  %v804_v46 = vsel %vm698_vm2, %v803_v40, %v799_v32  ;;  %v813_v26 = vrot.slane %v624_v45, %v710_v49  ;;  %v724_v38 = vsub.s32 %v721_v58, %v1841_v23 }
 0x205   :  { %v590_v50 = vpop.xlane.xlu0 %589  ;;  %v731_v45 = vsub.s32 %v728_v18, %v1841_v23  ;;  %v763_v32 = vadd.s32 4294967200, %v1957_v55  ;;  %vm649_vm1 = vcmp.lt.s32.totalorder %v1957_v55, 8 }
 0x206   :  { %v704_v20 = vrot.slane %v590_v50, %v703_v29  ;;  %v738_v50 = vsub.s32 %v735_v51, %v1841_v23 }
 0x207   :  { %v1954_v54 = vpop.xlane.xlu1 %629 }
 0x209   :  { %v588_v27 = vpop.xlane.xlu0 %587 }
 0x20a   :  { %v697_v25 = vrot.slane %v588_v27, %v696_v44  ;;  %v742_v27 = vadd.s32 4294967224, %v1957_v55  ;;  %v717_v44 = vsub.s32 %v714_v36, %v1841_v23  ;;  %v752_v36 = vsub.s32 %v749_v35, %v1841_v23 }
 0x20b   :  { %v1961_v19 = vpop.xlane.xlu1 %627  ;;  %v739_v35 = vrot.slane %v1940_v34, %v738_v50 }
 0x20c   :  { %v699_v47 = vsel %vm698_vm2, %v697_v25, %v692_v33  ;;  %v808_v33 = vrot.slane %v1948_v53, %v703_v29  ;;  %v753_v34 = vrot.slane %v1944_v37, %v752_v36  ;;  %vm874_vm2 = vcmask 1041408  }
 0x20d   :  { %v594_v30 = vpop.xlane.xlu0 %593  ;;  %v706_v21 = vsel %vm705_vm3, %v704_v20, %v699_v47  ;;  %v818_v20 = vrot.slane %v1952_v57, %v717_v44 }
 0x20e   :  { %v809_v58 = vsel %vm705_vm3, %v808_v33, %v804_v46  ;;  %v828_v33 = vrot.slane %v1954_v54, %v731_v45 }
 0x20f   :  { %v1969_v24 = vpop.xlane.xlu1 %633  ;;  %v814_v51 = vsel %vm712_vm4, %v813_v26, %v809_v58 }
 0x211   :  { %v592_v28 = vpop.xlane.xlu0 %591 }
 0x212   :  { %v711_v41 = vrot.slane %v592_v28, %v710_v49  ;;  %v745_v28 = vsub.s32 %v742_v27, %v1841_v23  ;;  %v718_v49 = vrot.slane %v594_v30, %v717_v44  ;;  %v823_v27 = vrot.slane %v1961_v19, %v724_v38 }
 0x213   :  { %v1977_v56 = vpop.xlane.xlu1 %631  ;;  %v759_v19 = vsub.s32 %v756_v59, %v1841_v23  ;;  %v766_v59 = vsub.s32 %v763_v32, %v1841_v23 }
 0x214   :  { %v713_v42 = vsel %vm712_vm4, %v711_v41, %v706_v21  ;;  %v746_v30 = vrot.slane %v1942_v48, %v745_v28  ;;  %v833_v44 = vrot.slane %v1977_v56, %v738_v50  ;;  %v784_v56 = vadd.s32 4294967176, %v1957_v55 }
 0x215   :  { %v598_v22 = vpop.xlane.xlu0 %597  ;;  %v720_v29 = vsel %vm719_vm5, %v718_v49, %v713_v42  ;;  %v770_v42 = vadd.s32 4294967192, %v1957_v55  ;;  %v760_v37 = vrot.slane %v1946_v39, %v759_v19 }
 0x216   :  { %v732_v53 = vrot.slane %v598_v22, %v731_v45  ;;  %v819_v22 = vsel %vm719_vm5, %v818_v20, %v814_v51  ;;  %v838_v45 = vrot.slane %v1969_v24, %v745_v28  ;;  %v787_v20 = vsub.s32 %v784_v56, %v1841_v23 }
 0x217   :  { %v1988_v25 = vpop.xlane.xlu1 %637  ;;  %v824_v57 = vsel %vm726_vm6, %v823_v27, %v819_v22 }
 0x219   :  { %v596_v40 = vpop.xlane.xlu0 %595 }
 0x21a   :  { %v725_v47 = vrot.slane %v596_v40, %v724_v38  ;;  %v777_v40 = vadd.s32 4294967184, %v1957_v55  ;;  %v955_v55 = vsub.s32 1, %v1841_v23 }
 0x21b   :  { %v636_v41 = vpop.xlane.xlu1 %635 }
 0x21c   :  { %v727_v18 = vsel %vm726_vm6, %v725_v47, %v720_v29  ;;  %v829_v47 = vsel %vm733_vm7, %v828_v33, %v824_v57  ;;  %v843_v51 = vrot.slane %v636_v41, %v752_v36  ;;  %v767_v29 = vrot.slane %v1950_v43, %v766_v59 }
 0x21d   :  { %v734_v46 = vsel %vm733_vm7, %v732_v53, %v727_v18  ;;  %v610_v26 = vpop.xlane.xlu0 %609  ;;  %v834_v50 = vsel %vm740_vm8, %v833_v44, %v829_v47  ;;  %v773_v53 = vsub.s32 %v770_v42, %v1841_v23  ;;  %v780_v39 = vsub.s32 %v777_v40, %v1841_v23 }
 0x21e   :  { %v741_v38 = vsel %vm740_vm8, %v739_v35, %v734_v46  ;;  %v839_v35 = vsel %vm747_vm9, %v838_v45, %v834_v50 }
 0x21f   :  { %v748_v48 = vsel %vm747_vm9, %v746_v30, %v741_v38  ;;  %v640_v21 = vpop.xlane.xlu1 %639  ;;  %v844_v18 = vsel %vm754_vm10, %v843_v51, %v839_v35  ;;  %v848_v30 = vrot.slane %v1988_v25, %v759_v19  ;;  %v774_v32 = vrot.slane %v610_v26, %v773_v53 }
 0x220   :  { %v755_v49 = vsel %vm754_vm10, %v753_v34, %v748_v48  ;;  %v853_v41 = vrot.slane %v640_v21, %v766_v59 }
 0x221   :  { %v612_v58 = vpop.xlane.xlu0 %611  ;;  %v762_v27 = vsel %vm761_vm11, %v760_v37, %v755_v49  ;;  %v849_v34 = vsel %vm761_vm11, %v848_v30, %v844_v18 }
 0x222   :  { %v769_v36 = vsel %vm768_vm12, %v767_v29, %v762_v27  ;;  %v781_v22 = vrot.slane %v612_v58, %v780_v39  ;;  %v854_v44 = vsel %vm768_vm12, %v853_v41, %v849_v34 }
 0x223   :  { %v642_v54 = vpop.xlane.xlu1 %641  ;;  %v776_v38 = vsel %vm775_vm13, %v774_v32, %v769_v36 }
 0x224   :  { %v858_v46 = vrot.slane %v642_v54, %v773_v53  ;;  %v783_v42 = vsel %vm782_vm14, %v781_v22, %v776_v38 }
 0x225   :  { %v614_v24 = vpop.xlane.xlu0 %613 }
 0x226   :  { %v788_v57 = vrot.slane %v614_v24, %v787_v20  ;;  %v859_v21 = vsel %vm775_vm13, %v858_v46, %v854_v44 }
 0x227   :  { %v644_v28 = vpop.xlane.xlu1 %643 }
 0x228   :  { %v863_v43 = vrot.slane %v644_v28, %v780_v39  ;;  %v790_v26 = vsel %vm789_vm15, %v788_v57, %v783_v42 }
 0x22a   :  { %v864_v25 = vsel %vm782_vm14, %v863_v43, %v859_v21 }
 0x22b   :  { %v646_v48 = vpop.xlane.xlu1 %645 }
 0x22c   :  { %v868_v33 = vrot.slane %v646_v48, %v787_v20 }
 0x22e   :  { %v869_v19 = vsel %vm789_vm15, %v868_v33, %v864_v25 }
 0x22f   :  { %v871_v59 = vsel %vm870_vm0, %v869_v19, %v790_v26 }
 0x230   :  { %v873_v49 = vsel %vm649_vm1, %v871_v59, -inf }
 0x231   :  { %v875_v40 = vsel %vm874_vm2, %v873_v49, -inf }
 0x232   :  { %876 = vmax.xlane.f32.xlu0 %v875_v40 }
 0x2bf   :  { %v877_v58 = vpop.xlane.xlu0 %876 }
 0x2c0   :  { %v878_v37 = vsub.f32 %v873_v49, %v877_v58 }
 0x2c2   :  { %v879_v47 = vmul.f32 1.442695, %v878_v37 }
 0x2c4   :  { %1461 = vpow2.f32 %v879_v47 }
 0x2ce   :  { %v1462_v56 = vpop.eup %1461 }
 0x2cf   :  { %v881_v50 = vsel %vm874_vm2, %v1462_v56, 0.0 }
 0x2d0   :  { %882 = vadd.xlane.f32.xlu1 %v881_v50 }
 0x35d   :  { %v883_v51 = vpop.xlane.xlu1 %882 }
 0x35e   :  { %1463 = vrcp.f32 %v883_v51 }
 0x368   :  { %v1464_v54 = vpop.eup %1463 }
 0x369   :  { %v885_v45 = vmul.f32 %v1464_v54, %v1462_v56 }
 0x36b   :  { %v889_v27 = vrot.slane %v885_v45, %v1848_v31  ;;  %1099 = vst [vmem:[#allocation11] sm:$0x3] %v885_v45  ;;  %v956_v53 = vrot.slane %v885_v45, %v955_v55 }
 0x36d   :  { %895 = vbcast.lane.b32.xlu1 %v889_v27, 264  ;;  %891 = vbcast.lane.b32.xlu0 %v889_v27, 256 }
 0x371   :  { %958 = vbcast.lane.b32.xlu1 %v956_v53, 256  ;;  %899 = vbcast.lane.b32.xlu0 %v889_v27, 272 }
 0x375   :  { %962 = vbcast.lane.b32.xlu1 %v956_v53, 264  ;;  %903 = vbcast.lane.b32.xlu0 %v889_v27, 280 }
 0x379   :  { %966 = vbcast.lane.b32.xlu1 %v956_v53, 272  ;;  %907 = vbcast.lane.b32.xlu0 %v889_v27, 288 }
 0x37d   :  { %970 = vbcast.lane.b32.xlu1 %v956_v53, 280  ;;  %911 = vbcast.lane.b32.xlu0 %v889_v27, 296 }
 0x381   :  { %974 = vbcast.lane.b32.xlu1 %v956_v53, 288  ;;  %915 = vbcast.lane.b32.xlu0 %v889_v27, 304 }
 0x385   :  { %978 = vbcast.lane.b32.xlu1 %v956_v53, 296  ;;  %919 = vbcast.lane.b32.xlu0 %v889_v27, 312 }
 0x389   :  { %982 = vbcast.lane.b32.xlu1 %v956_v53, 304  ;;  %923 = vbcast.lane.b32.xlu0 %v889_v27, 320 }
 0x38d   :  { %986 = vbcast.lane.b32.xlu1 %v956_v53, 312  ;;  %927 = vbcast.lane.b32.xlu0 %v889_v27, 328 }
 0x391   :  { %990 = vbcast.lane.b32.xlu1 %v956_v53, 320  ;;  %931 = vbcast.lane.b32.xlu0 %v889_v27, 336 }
 0x395   :  { %994 = vbcast.lane.b32.xlu1 %v956_v53, 328  ;;  %935 = vbcast.lane.b32.xlu0 %v889_v27, 344 }
 0x399   :  { %998 = vbcast.lane.b32.xlu1 %v956_v53, 336  ;;  %939 = vbcast.lane.b32.xlu0 %v889_v27, 352 }
 0x39d   :  { %1002 = vbcast.lane.b32.xlu1 %v956_v53, 344  ;;  %943 = vbcast.lane.b32.xlu0 %v889_v27, 360 }
 0x3a1   :  { %1006 = vbcast.lane.b32.xlu1 %v956_v53, 352  ;;  %947 = vbcast.lane.b32.xlu0 %v889_v27, 368 }
 0x3a5   :  { %1010 = vbcast.lane.b32.xlu1 %v956_v53, 360  ;;  %951 = vbcast.lane.b32.xlu0 %v889_v27, 376 }
 0x3a9   :  { %1014 = vbcast.lane.b32.xlu1 %v956_v53, 368 }
 0x3ad   :  { %1018 = vbcast.lane.b32.xlu1 %v956_v53, 376 }
 0x3ae   :  { %1572 = shalt.err (!%p1569_p8)
}
 0x3af   :  { %s1573_s30 = scalar_lea.hbm %s2097_s7, 32 }
 0x3b0   :  { %p1574_p9 = scmp.ne.s32.totalorder %s2097_s7, %s1573_s30  ;;  %p1577_p10 = scmp.lt.u32.totalorder %s1573_s30, %s2097_s7 }
 0x3b2   :  { %p1579_p11 = pnand %p1577_p10, %p1574_p9 }
 0x3b4   :  { %1582 = shalt.err (!%p1579_p11)
}
 0x3b5   :  { %1119 = dma.vmem_to_hbm [thread:$0]  %s1117_s25, 32, %s2097_s7, [#allocation12]   ;;  %v1465_v54 = vld [vmem:[#allocation5 + $0x40] sm:$0xff]  ;;  %v1466_v27 = vld [vmem:[#allocation5 + $0x48] sm:$0xff] }
 0x3b6   :  { %s1626_s7 = smov [#allocation10]  }
 0x3b7   :  { %s1106_s15 = sshll.u32 %s1626_s7, 4  ;;  %s1107_s15 = int_to_ptr.vmem [resolvable:$true] %s1106_s15 }
 0x3b8   :  { %s1583_s16 = scalar_lea.vmem %s1107_s15, 32  ;;  %p1588_p13 = scmp.lt.s32.totalorder %s1107_s15, %s1107_s15 }
 0x3b9   :  { %p1584_p12 = scmp.ne.s32.totalorder %s1107_s15, %s1583_s16  ;;  %p1589_p0 = scmp.lt.s32.totalorder %s1583_s16, %s1583_s16 }
 0x3bb   :  { %p1590_p1 = por %p1589_p0, %p1588_p13 }
 0x3bd   :  { %p1591_p2 = pnand %p1590_p1, %p1584_p12 }
 0x3df   :  { %v896_v23 = vpop.permute.xlu1 %895  ;;  %v892_v31 = vpop.permute.xlu0 %891 }
 0x3e0   :  { %v1021_v22 = vmul.f32 %v896_v23, %v1796_v5  ;;  %v1020_v43 = vmul.f32 %v892_v31, %v1757_v52 }
 0x3e2   :  { %v1052_v44 = vadd.f32 %v1021_v22, %v1020_v43 }
 0x3e3   :  { %v959_v29 = vpop.permute.xlu1 %958  ;;  %v900_v39 = vpop.permute.xlu0 %899 }
 0x3e4   :  { %v1022_v57 = vmul.f32 %v900_v39, %v1799_v6  ;;  %v1036_v52 = vmul.f32 %v959_v29, %v1766_v60  ;;  %v1467_v29 = vld [vmem:[#allocation5 + $0x50] sm:$0xff] }
 0x3e6   :  { %v1053_v42 = vadd.f32 %v1052_v44, %v1022_v57 }
 0x3e7   :  { %v963_v35 = vpop.permute.xlu1 %962  ;;  %v904_v20 = vpop.permute.xlu0 %903 }
 0x3e8   :  { %v1023_v48 = vmul.f32 %v904_v20, %v1808_v9  ;;  %v1037_v26 = vmul.f32 %v963_v35, %v1771_v61 }
 0x3ea   :  { %v1054_v19 = vadd.f32 %v1053_v42, %v1023_v48  ;;  %v1073_v9 = vadd.f32 %v1037_v26, %v1036_v52  ;;  %v1472_v52 = vld [vmem:[#allocation5 + $0x78] sm:$0xff] }
 0x3eb   :  { %v967_v18 = vpop.permute.xlu1 %966  ;;  %v908_v36 = vpop.permute.xlu0 %907 }
 0x3ec   :  { %v1024_v25 = vmul.f32 %v908_v36, %v1811_v10  ;;  %v1038_v40 = vmul.f32 %v967_v18, %v1773_v62  ;;  %v1468_v18 = vld [vmem:[#allocation5 + $0x58] sm:$0xff] }
 0x3ee   :  { %v1055_v6 = vadd.f32 %v1054_v19, %v1024_v25  ;;  %v1074_v50 = vadd.f32 %v1073_v9, %v1038_v40 }
 0x3ef   :  { %v971_v41 = vpop.permute.xlu1 %970  ;;  %v912_v24 = vpop.permute.xlu0 %911 }
 0x3f0   :  { %v1025_v59 = vmul.f32 %v912_v24, %v1820_v13  ;;  %v1039_v37 = vmul.f32 %v971_v41, %v1779_v63 }
 0x3f2   :  { %v1056_v47 = vadd.f32 %v1055_v6, %v1025_v59  ;;  %v1075_v60 = vadd.f32 %v1074_v50, %v1039_v37 }
 0x3f3   :  { %v975_v28 = vpop.permute.xlu1 %974  ;;  %v916_v30 = vpop.permute.xlu0 %915 }
 0x3f4   :  { %v1026_v58 = vmul.f32 %v916_v30, %v1823_v14  ;;  %v1040_v13 = vmul.f32 %v975_v28, %v1781_v0 }
 0x3f6   :  { %v1057_v51 = vadd.f32 %v1056_v47, %v1026_v58  ;;  %v1076_v63 = vadd.f32 %v1075_v60, %v1040_v13  ;;  %v2100_v13 = vld [vmem:[#allocation18_spill] sm:$0xff] }
 0x3f7   :  { %v979_v32 = vpop.permute.xlu1 %978  ;;  %v920_v46 = vpop.permute.xlu0 %919 }
 0x3f8   :  { %v1027_v10 = vmul.f32 %v920_v46, %v1832_v17  ;;  %v1041_v62 = vmul.f32 %v979_v32, %v1786_v1  ;;  %v1469_v32 = vld [vmem:[#allocation5 + $0x60] sm:$0xff] }
 0x3fa   :  { %v1058_v55 = vadd.f32 %v1057_v51, %v1027_v10  ;;  %v1077_v35 = vadd.f32 %v1076_v63, %v1041_v62 }
 0x3fb   :  { %v983_v38 = vpop.permute.xlu1 %982  ;;  %v924_v34 = vpop.permute.xlu0 %923 }
 0x3fc   :  { %v1028_v45 = vmul.f32 %v1465_v54, %v924_v34  ;;  %v1042_v31 = vmul.f32 %v983_v38, %v1788_v2  ;;  %v1470_v38 = vld [vmem:[#allocation5 + $0x68] sm:$0xff] }
 0x3fe   :  { %v1059_v17 = vadd.f32 %v1058_v55, %v1028_v45  ;;  %v1078_v1 = vadd.f32 %v1077_v35, %v1042_v31 }
 0x3ff   :  { %v987_v21 = vpop.permute.xlu1 %986  ;;  %v928_v33 = vpop.permute.xlu0 %927 }
 0x400   :  { %v1029_v14 = vmul.f32 %v1466_v27, %v928_v33  ;;  %v1043_v0 = vmul.f32 %v987_v21, %v1792_v3  ;;  %v1471_v33 = vld [vmem:[#allocation5 + $0x70] sm:$0xff] }
 0x402   :  { %v1060_v20 = vadd.f32 %v1059_v17, %v1029_v14  ;;  %v1079_v22 = vadd.f32 %v1078_v1, %v1043_v0 }
 0x403   :  { %v991_v5 = vpop.permute.xlu1 %990  ;;  %v932_v49 = vpop.permute.xlu0 %931 }
 0x404   :  { %v1030_v39 = vmul.f32 %v1467_v29, %v932_v49  ;;  %v1044_v28 = vmul.f32 %v991_v5, %v1794_v4 }
 0x406   :  { %v1061_v30 = vadd.f32 %v1060_v20, %v1030_v39  ;;  %v1080_v3 = vadd.f32 %v1079_v22, %v1044_v28 }
 0x407   :  { %v995_v56 = vpop.permute.xlu1 %994  ;;  %v936_v61 = vpop.permute.xlu0 %935 }
 0x408   :  { %v1031_v36 = vmul.f32 %v1468_v18, %v936_v61  ;;  %v1045_v2 = vmul.f32 %v995_v56, %v1802_v7 }
 0x40a   :  { %v1062_v43 = vadd.f32 %v1061_v30, %v1031_v36  ;;  %v1081_v25 = vadd.f32 %v1080_v3, %v1045_v2 }
 0x40b   :  { %v999_v53 = vpop.permute.xlu1 %998  ;;  %v940_v23 = vpop.permute.xlu0 %939 }
 0x40c   :  { %v1032_v46 = vmul.f32 %v1469_v32, %v940_v23  ;;  %v1046_v48 = vmul.f32 %v999_v53, %v1805_v8 }
 0x40e   :  { %v1063_v21 = vadd.f32 %v1062_v43, %v1032_v46  ;;  %v1082_v5 = vadd.f32 %v1081_v25, %v1046_v48 }
 0x40f   :  { %v1003_v41 = vpop.permute.xlu1 %1002  ;;  %v944_v24 = vpop.permute.xlu0 %943 }
 0x410   :  { %v1033_v34 = vmul.f32 %v1470_v38, %v944_v24  ;;  %v1047_v4 = vmul.f32 %v1003_v41, %v1814_v11 }
 0x412   :  { %v1064_v26 = vadd.f32 %v1063_v21, %v1033_v34  ;;  %v1083_v6 = vadd.f32 %v1082_v5, %v1047_v4 }
 0x413   :  { %v1007_v57 = vpop.permute.xlu1 %1006  ;;  %v948_v44 = vpop.permute.xlu0 %947 }
 0x414   :  { %v1034_v42 = vmul.f32 %v1471_v33, %v948_v44  ;;  %v1048_v7 = vmul.f32 %v1007_v57, %v1817_v12 }
 0x416   :  { %v1065_v49 = vadd.f32 %v1064_v26, %v1034_v42  ;;  %v1084_v37 = vadd.f32 %v1083_v6, %v1048_v7 }
 0x417   :  { %v1011_v19 = vpop.permute.xlu1 %1010  ;;  %v952_v59 = vpop.permute.xlu0 %951 }
 0x418   :  { %v1035_v40 = vmul.f32 %v1472_v52, %v952_v59  ;;  %v1049_v58 = vmul.f32 %v1011_v19, %v1826_v15 }
 0x41a   :  { %v1066_v9 = vadd.f32 %v1065_v49, %v1035_v40  ;;  %v1085_v56 = vadd.f32 %v1084_v37, %v1049_v58 }
 0x41b   :  { %v1015_v8 = vpop.permute.xlu1 %1014 }
 0x41c   :  { %v1067_v47 = vrot.slane %v1066_v9, 4  ;;  %v1050_v10 = vmul.f32 %v1015_v8, %v1829_v16 }
 0x41e   :  { %v1068_v11 = vadd.f32 %v1067_v47, %v1066_v9  ;;  %v1086_v50 = vadd.f32 %v1085_v56, %v1050_v10 }
 0x41f   :  { %v1019_v61 = vpop.permute.xlu1 %1018 }
 0x420   :  { %v1051_v51 = vmul.f32 %v1019_v61, %v2100_v13  ;;  %v1069_v54 = vrot.slane %v1068_v11, 2 }
 0x422   :  { %v1087_v12 = vadd.f32 %v1086_v50, %v1051_v51  ;;  %v1070_v60 = vadd.f32 %v1069_v54, %v1068_v11 }
 0x424   :  { %v1088_v45 = vrot.slane %v1087_v12, 4  ;;  %v1071_v27 = vrot.slane %v1070_v60, 1 }
 0x426   :  { %v1089_v62 = vadd.f32 %v1088_v45, %v1087_v12  ;;  %v1072_v53 = vadd.f32 %v1071_v27, %v1070_v60 }
 0x428   :  { %v1090_v55 = vrot.slane %v1089_v62, 2 }
 0x42a   :  { %v1091_v15 = vadd.f32 %v1090_v55, %v1089_v62 }
 0x42c   :  { %v1092_v14 = vrot.slane %v1091_v15, 1 }
 0x42e   :  { %v1093_v23 = vadd.f32 %v1092_v14, %v1091_v15 }
 0x430   :  { %v1096_v16 = vsel %vm870_vm0, %v1093_v23, %v1072_v53 }
 0x431   :  { %1098 = vst [vmem:[#allocation10] sm:$0x3] %v1096_v16 }
 0x432   :  { %1594 = shalt.err (!%p1591_p2)
}
 0x433   :  { %s1595_s20 = scalar_lea.hbm %s2096_s6, 32 }
 0x434   :  { %p1596_p3 = scmp.ne.s32.totalorder %s2096_s6, %s1595_s20  ;;  %p1599_p4 = scmp.lt.u32.totalorder %s1595_s20, %s2096_s6 }
 0x436   :  { %p1601_p5 = pnand %p1599_p4, %p1596_p3 }
 0x438   :  { %1604 = shalt.err (!%p1601_p5)
}
 0x439   :  { %1109 = dma.vmem_to_hbm [thread:$0]  %s1107_s15, 32, %s2096_s6, [#allocation4]  }
 0x43a   :  { %1611 = dma.done.wait [#allocation4], 32  }
 0x43b   :  { %1612 = vsyncadd [#allocation4], 4294967264 }
 0x43c   :  { %1613 = dma.done.wait [#allocation12], 32  }
 0x43d   :  { %1614 = vsyncadd [#allocation12], 4294967264 }
 0x43e   :  { %1126 = vsyncpa [#allocation3], 1 }
 0x43f   :  { %1127 = vsyncpa [#allocation6], 1 }
 0x440   :  { %1128 = vsyncpa [#allocation9], 1 }
 0x441   :  { %1129 = vsyncpa [#allocation4], 1 }
 0x442   :  { %1130 = vsyncpa [#allocation12], 1 }

</bundles_post_ra>
